<compile_context>
chip_gen: v6e
topology: v6e:2x2x1
jax: 0.10.0
libtpu: 0.0.40
codegen_flags: <defaults>
</compile_context>

<pallas_src>
import functools
import math

import jax
import jax.numpy as jnp
from jax.experimental import pallas as pl
from jax.experimental.pallas import tpu as pltpu


def _rnn_gate_kernel(xh_ref, c0_ref, w_ref, wp_ref, rand_ref, bp_ref,
                     disc_ref, prob_ref, h_out_ref, c_out_ref, *, hidden_dim):
    H = hidden_dim

    # Single fused MXU pass.  Column layout of the 4H gate axis follows
    # PyTorch's nn.LSTM order: [i, f, g, o]; the bias is a row of w_ref hit by
    # the ones block appended to xh in the wrapper.
    gates = jnp.dot(xh_ref[...], w_ref[...],
                    preferred_element_type=jnp.float32)            # (B, 4H)

    # Full-vreg activations: 2 EUP pushes (sigmoid + tanh) instead of 4
    # quarter-lane ones; select tanh for the g block with a lane mask.
    lane = jax.lax.broadcasted_iota(jnp.int32, gates.shape, dimension=1)
    is_g = jnp.logical_and(lane >= 2 * H, lane < 3 * H)
    act = jnp.where(is_g, jnp.tanh(gates), jax.nn.sigmoid(gates))  # [si,sf,tg,so]

    # XLU roll by half the gate axis aligns (g, o) over (i, f); i*g then falls
    # out of a single full-vreg VPU multiply.
    rolled = pltpu.roll(act, shift=2 * H, axis=1)                  # [tg,so,si,sf]
    prod = act * rolled

    i_g = prod[:, 0:H]                    # sigmoid(i) * tanh(g)
    f_gate = act[:, H:2 * H]              # sigmoid(f)
    o_gate = act[:, 3 * H:4 * H]          # sigmoid(o)

    c_new = f_gate * c0_ref[...] + i_g
    h_new = o_gate * jnp.tanh(c_new)

    # Linear(hidden_dim -> 1) as VPU multiply + lane reduction (avoids an N=1
    # MXU matmul and its result-FIFO drain); bias is an SMEM scalar.
    proj = jnp.sum(h_new * wp_ref[...], axis=-1, keepdims=True) + bp_ref[0]
    prob = jax.nn.sigmoid(proj)

    # Straight-through hard gate; forward value of
    # (prob > tmp).float().detach() - prob.detach() + prob == (prob > tmp).
    # TODO(synk): training use needs jax.custom_vjp for the STE gradient.
    disc_ref[...] = (prob > rand_ref[...]).astype(jnp.float32)
    prob_ref[...] = prob
    h_out_ref[...] = h_new
    c_out_ref[...] = c_new


def rnn_gate_forward(x, h0, c0, w_fused, w_proj_row, b_proj, rand_u):
    """One RNNGate.forward step.  Returns (disc_prob, prob, (h_new, c_new))."""
    B, D = x.shape
    H = h0.shape[1]
    OC = rand_u.shape[1]
    K = w_fused.shape[0]          # D + H + 1, rounded up to a multiple of 8

    # Fold the recurrent input and the LSTM bias into one matmul operand:
    # [x | h0 | 1 ... 1].  Row D+H of w_fused holds (b_ih + b_hh); remaining
    # pad rows are zero, so the extra ones columns contribute nothing.
    xh1 = jnp.concatenate([x, h0, jnp.ones((B, K - D - H), x.dtype)], axis=1)

    vmem = pl.BlockSpec(memory_space=pltpu.MemorySpace.VMEM)
    smem = pl.BlockSpec(memory_space=pltpu.MemorySpace.SMEM)

    kernel = functools.partial(_rnn_gate_kernel, hidden_dim=H)
    disc, prob, h_new, c_new = pl.pallas_call(
        kernel,
        out_shape=(
            jax.ShapeDtypeStruct((B, OC), jnp.float32),   # disc (before view)
            jax.ShapeDtypeStruct((B, OC), jnp.float32),   # prob
            jax.ShapeDtypeStruct((B, H), jnp.float32),    # h
            jax.ShapeDtypeStruct((B, H), jnp.float32),    # c
        ),
        in_specs=[vmem, vmem, vmem, vmem, vmem, smem],
        out_specs=(vmem, vmem, vmem, vmem),
        input_output_aliases={1: 3},   # c0 buffer reused in place for c_new
    )(xh1, c0, w_fused, w_proj_row, rand_u, b_proj)

    disc_prob = disc.reshape(B, -1, 1, 1)    # .view(batch, -1, 1, 1)
    return disc_prob, prob, (h_new, c_new)


def make_params(key, input_dim, hidden_dim, output_channel=1):
    """Deterministic synthetic params with nn.LSTM / nn.Linear shapes, packed
    into the fused layout the kernel expects."""
    assert output_channel == 1, "VPU projection path assumes output_channel=1"
    k = jax.random.split(key, 6)
    s = 1.0 / math.sqrt(hidden_dim)

    # nn.LSTM: weight_ih_l0 (4H, D), weight_hh_l0 (4H, H), biases (4H,)
    w_ih = jax.random.uniform(k[0], (4 * hidden_dim, input_dim), jnp.float32, -s, s)
    w_hh = jax.random.uniform(k[1], (4 * hidden_dim, hidden_dim), jnp.float32, -s, s)
    b_ih = jax.random.uniform(k[2], (4 * hidden_dim,), jnp.float32, -s, s)
    b_hh = jax.random.uniform(k[3], (4 * hidden_dim,), jnp.float32, -s, s)
    # nn.Linear(hidden_dim, 1): weight (1, H), bias (1,)
    w_proj = jax.random.uniform(k[4], (output_channel, hidden_dim), jnp.float32, -s, s)
    b_proj = jax.random.uniform(k[5], (output_channel,), jnp.float32, -s, s)

    # Fused weight: [W_ih^T ; W_hh^T ; (b_ih+b_hh) ; zero pad] -> (K_pad, 4H),
    # with K_pad = round_up(D + H + 1, 8) so the MXU contraction is aligned.
    k_raw = input_dim + hidden_dim + 1
    k_pad = ((k_raw + 7) // 8) * 8
    w_fused = jnp.concatenate([
        w_ih.T,                                               # (D, 4H)
        w_hh.T,                                               # (H, 4H)
        (b_ih + b_hh).reshape(1, 4 * hidden_dim),             # bias row
        jnp.zeros((k_pad - k_raw, 4 * hidden_dim), jnp.float32),
    ], axis=0)

    return dict(
        w_fused=w_fused,                                      # (K_pad, 4H)
        w_proj_row=w_proj.reshape(1, hidden_dim),             # (1, H)
        b_proj=b_proj.reshape(output_channel,),               # (1,) SMEM scalar
    )


def _reference_forward(x, h0, c0, params, rand_u):
    """Pure-JAX reference of the PyTorch forward (for a sanity check)."""
    D = x.shape[1]
    H = h0.shape[1]
    w_ih_t = params["w_fused"][:D]
    w_hh_t = params["w_fused"][D:D + H]
    b = params["w_fused"][D + H]
    gates = x @ w_ih_t + h0 @ w_hh_t + b
    i, f, g, o = jnp.split(gates, 4, axis=1)
    i, f, o = jax.nn.sigmoid(i), jax.nn.sigmoid(f), jax.nn.sigmoid(o)
    g = jnp.tanh(g)
    c = f * c0 + i * g
    h = o * jnp.tanh(c)
    prob = jax.nn.sigmoid(h @ params["w_proj_row"].T + params["b_proj"])
    return prob, h, c


if __name__ == "__main__":
    batch = 8
    input_dim = 32
    hidden_dim = 32
    output_channel = 1

    root = jax.random.PRNGKey(0)
    k_param, k_x, k_rand = jax.random.split(root, 3)

    params = make_params(k_param, input_dim, hidden_dim, output_channel)

    # Input "already passed through average pooling and embedding".
    x = jax.random.normal(k_x, (batch, input_dim), jnp.float32)
    # self.hidden starts as None -> zero initial (h, c).
    h0 = jnp.zeros((batch, hidden_dim), jnp.float32)
    c0 = jnp.zeros((batch, hidden_dim), jnp.float32)
    # tmp = torch.rand_like(prob): uniform [0, 1) noise for the hard gate.
    rand_u = jax.random.uniform(k_rand, (batch, output_channel), jnp.float32)

    # Reference computed BEFORE the kernel call (c0 may be aliased/donated).
    ref_prob, ref_h, ref_c = jax.block_until_ready(
        _reference_forward(x, h0, c0, params, rand_u))

    forward = jax.jit(rnn_gate_forward)
    disc_prob, prob, hidden = forward(
        x, h0, c0,
        params["w_fused"], params["w_proj_row"], params["b_proj"], rand_u)
    jax.block_until_ready((disc_prob, prob, hidden))

    assert disc_prob.shape == (batch, 1, 1, 1)
    assert prob.shape == (batch, output_channel)
    assert hidden[0].shape == (batch, hidden_dim)
    assert hidden[1].shape == (batch, hidden_dim)

    assert jnp.allclose(prob, ref_prob, atol=1e-4, rtol=1e-4)
    assert jnp.allclose(hidden[0], ref_h, atol=1e-4, rtol=1e-4)
    assert jnp.allclose(hidden[1], ref_c, atol=1e-4, rtol=1e-4)
    assert jnp.array_equal(disc_prob.reshape(batch, output_channel),
                           (prob > rand_u).astype(jnp.float32))

    print("KERNEL_OK")
</pallas_src>

<mosaic_0001>
module attributes {stable_mosaic.version = 11 : i64} {
  func.func @_rnn_gate_kernel(%arg0: memref<8x72xf32, #tpu.memory_space<vmem>>, %arg1: memref<8x32xf32, #tpu.memory_space<vmem>>, %arg2: memref<72x128xf32, #tpu.memory_space<vmem>>, %arg3: memref<1x32xf32, #tpu.memory_space<vmem>>, %arg4: memref<8x1xf32, #tpu.memory_space<vmem>>, %arg5: memref<1xf32, #tpu.memory_space<smem>>, %arg6: memref<8x1xf32, #tpu.memory_space<vmem>>, %arg7: memref<8x1xf32, #tpu.memory_space<vmem>>, %arg8: memref<8x32xf32, #tpu.memory_space<vmem>>, %arg9: memref<8x32xf32, #tpu.memory_space<vmem>>) attributes {dimension_semantics = [], scalar_prefetch = 0 : i64, scratch_operands = 0 : i64, tpu.core_type = #tpu.core_type<tc>} {
    %c0 = arith.constant 0 : index
    %c0_0 = arith.constant 0 : index
    %0 = vector.load %arg0[%c0, %c0_0] : memref<8x72xf32, #tpu.memory_space<vmem>>, vector<8x72xf32>
    %c0_1 = arith.constant 0 : index
    %c0_2 = arith.constant 0 : index
    %1 = vector.load %arg2[%c0_1, %c0_2] : memref<72x128xf32, #tpu.memory_space<vmem>>, vector<72x128xf32>
    %cst = arith.constant dense<0.000000e+00> : vector<8x128xf32>
    %2 = tpu.matmul %0, %1, %cst {dimension_numbers = #tpu.dot_dimension_numbers<[1], [0], [0], [1], [0, 0, 1, 1], [], []>} : vector<8x72xf32>, vector<72x128xf32>, vector<8x128xf32> -> vector<8x128xf32>
    %3 = tpu.iota {dimensions = array<i32: 1>} : vector<8x128xi32>
    %c64_i32 = arith.constant 64 : i32
    %4 = vector.broadcast %c64_i32 : i32 to vector<8x128xi32>
    %5 = arith.cmpi sge, %3, %4 : vector<8x128xi32>
    %c96_i32 = arith.constant 96 : i32
    %6 = vector.broadcast %c96_i32 : i32 to vector<8x128xi32>
    %7 = arith.cmpi slt, %3, %6 : vector<8x128xi32>
    %8 = arith.andi %5, %7 : vector<8x128xi1>
    %9 = math.tanh %2 : vector<8x128xf32>
    %10 = arith.negf %2 : vector<8x128xf32>
    %11 = math.exp %10 : vector<8x128xf32>
    %cst_3 = arith.constant 1.000000e+00 : f32
    %12 = vector.broadcast %cst_3 : f32 to vector<8x128xf32>
    %13 = arith.addf %12, %11 : vector<8x128xf32>
    %14 = arith.divf %12, %13 : vector<8x128xf32>
    %15 = arith.select %8, %9, %14 : vector<8x128xi1>, vector<8x128xf32>
    %c64_i32_4 = arith.constant 64 : i32
    %16 = tpu.dynamic_rotate %15 by %c64_i32_4 dim 1 : vector<8x128xf32>, i32 -> vector<8x128xf32>
    %17 = arith.mulf %15, %16 : vector<8x128xf32>
    %18 = vector.extract_strided_slice %17 {offsets = [0, 0], sizes = [8, 32], strides = [1, 1]} : vector<8x128xf32> to vector<8x32xf32>
    %19 = vector.extract_strided_slice %15 {offsets = [0, 32], sizes = [8, 32], strides = [1, 1]} : vector<8x128xf32> to vector<8x32xf32>
    %20 = vector.extract_strided_slice %15 {offsets = [0, 96], sizes = [8, 32], strides = [1, 1]} : vector<8x128xf32> to vector<8x32xf32>
    %c0_5 = arith.constant 0 : index
    %c0_6 = arith.constant 0 : index
    %21 = vector.load %arg1[%c0_5, %c0_6] : memref<8x32xf32, #tpu.memory_space<vmem>>, vector<8x32xf32>
    %22 = arith.mulf %19, %21 : vector<8x32xf32>
    %23 = arith.addf %22, %18 : vector<8x32xf32>
    %24 = math.tanh %23 : vector<8x32xf32>
    %25 = arith.mulf %20, %24 : vector<8x32xf32>
    %c0_7 = arith.constant 0 : index
    %c0_8 = arith.constant 0 : index
    %26 = vector.load %arg3[%c0_7, %c0_8] : memref<1x32xf32, #tpu.memory_space<vmem>>, vector<1x32xf32>
    %27 = vector.broadcast %26 : vector<1x32xf32> to vector<8x32xf32>
    %28 = arith.mulf %25, %27 : vector<8x32xf32>
    %cst_9 = arith.constant dense<0.000000e+00> : vector<8xf32>
    %29 = vector.multi_reduction <add>, %28, %cst_9 [1] : vector<8x32xf32> to vector<8xf32>
    %30 = vector.shape_cast %29 : vector<8xf32> to vector<8x1xf32>
    %c0_10 = arith.constant 0 : index
    %31 = memref.load %arg5[%c0_10] : memref<1xf32, #tpu.memory_space<smem>>
    %32 = vector.broadcast %31 : f32 to vector<8x1xf32>
    %33 = arith.addf %30, %32 : vector<8x1xf32>
    %34 = arith.negf %33 : vector<8x1xf32>
    %35 = math.exp %34 : vector<8x1xf32>
    %cst_11 = arith.constant 1.000000e+00 : f32
    %36 = vector.broadcast %cst_11 : f32 to vector<8x1xf32>
    %37 = arith.addf %36, %35 : vector<8x1xf32>
    %38 = arith.divf %36, %37 : vector<8x1xf32>
    %c0_12 = arith.constant 0 : index
    %c0_13 = arith.constant 0 : index
    %39 = vector.load %arg4[%c0_12, %c0_13] : memref<8x1xf32, #tpu.memory_space<vmem>>, vector<8x1xf32>
    %40 = arith.cmpf ogt, %38, %39 : vector<8x1xf32>
    %41 = arith.extui %40 : vector<8x1xi1> to vector<8x1xi32>
    %42 = arith.sitofp %41 : vector<8x1xi32> to vector<8x1xf32>
    %c0_14 = arith.constant 0 : index
    %c0_15 = arith.constant 0 : index
    %43 = vector.load %arg6[%c0_14, %c0_15] : memref<8x1xf32, #tpu.memory_space<vmem>>, vector<8x1xf32>
    tpu.vector_store %arg6[%c0_14, %c0_15], %42 {strides = array<i32>} : memref<8x1xf32, #tpu.memory_space<vmem>>, vector<8x1xf32>,
    %c0_16 = arith.constant 0 : index
    %c0_17 = arith.constant 0 : index
    %44 = vector.load %arg7[%c0_16, %c0_17] : memref<8x1xf32, #tpu.memory_space<vmem>>, vector<8x1xf32>
    tpu.vector_store %arg7[%c0_16, %c0_17], %38 {strides = array<i32>} : memref<8x1xf32, #tpu.memory_space<vmem>>, vector<8x1xf32>,
    %c0_18 = arith.constant 0 : index
    %c0_19 = arith.constant 0 : index
    %45 = vector.load %arg8[%c0_18, %c0_19] : memref<8x32xf32, #tpu.memory_space<vmem>>, vector<8x32xf32>
    tpu.vector_store %arg8[%c0_18, %c0_19], %25 {strides = array<i32>} : memref<8x32xf32, #tpu.memory_space<vmem>>, vector<8x32xf32>,
    %c0_20 = arith.constant 0 : index
    %c0_21 = arith.constant 0 : index
    %46 = vector.load %arg9[%c0_20, %c0_21] : memref<8x32xf32, #tpu.memory_space<vmem>>, vector<8x32xf32>
    tpu.vector_store %arg9[%c0_20, %c0_21], %23 {strides = array<i32>} : memref<8x32xf32, #tpu.memory_space<vmem>>, vector<8x32xf32>,
    return
  }
}

</mosaic_0001>

<bundles_post_ra>
// kernel: rnn_gate_forward.1
= control target key start
LH: loop header
LB: loop body
LE: loop exit
PB: predicated region body
PF: predicated region fallthrough
CT: control target
= control target key end

     0   :  { %16 = vsyncpa [#allocation4], 0  ;;  %s432_s0 = inlined_call_operand.vmem [shape: f32[8,72], index: 0, kind: input, shape index: {}]   ;;  %s433_s1 = inlined_call_operand.vmem [shape: f32[8,32], index: 1, kind: input, shape index: {}, may-alias: {1,9}]   ;;  %s434_s2 = inlined_call_operand.hbm [shape: f32[72,128], index: 2, kind: input, shape index: {}]   ;;  %s435_s3 = inlined_call_operand.vmem [shape: f32[1,32], index: 3, kind: input, shape index: {}]   ;;  %s436_s4 = inlined_call_operand.vmem [shape: f32[8,1], index: 4, kind: input, shape index: {}]   ;;  %s437_s5 = inlined_call_operand.<no memory space> [shape: f32[1], index: 5, kind: input, shape index: {}]   ;;  %s438_s6 = inlined_call_operand.vmem [shape: f32[8,1], index: 6, kind: output, shape index: {0}]   ;;  %s439_s7 = inlined_call_operand.vmem [shape: f32[8,1], index: 7, kind: output, shape index: {1}]   ;;  %s440_s8 = inlined_call_operand.hbm [shape: f32[8,32], index: 8, kind: output, shape index: {2}]   ;;  %s441_s9 = inlined_call_operand.vmem [shape: f32[8,32], index: 9, kind: output, shape index: {3}, may-alias: {1,9}]  }
   0x1   :  { %17 = vsyncpa [#allocation5], 0  ;;  %s332_s30 = smov [#allocation3]  }
   0x2   :  { %s27_s10 = sshll.u32 %s332_s30, 4  ;;  %s28_s10 = int_to_ptr.vmem [resolvable:$true] %s27_s10 }
   0x3   :  { %s296_s11 = scalar_lea.vmem %s28_s10, 1152  ;;  %p301_p1 = scmp.lt.s32.totalorder %s28_s10, %s28_s10 }
   0x4   :  { %p297_p0 = scmp.ne.s32.totalorder %s28_s10, %s296_s11  ;;  %p302_p2 = scmp.lt.s32.totalorder %s296_s11, %s296_s11 }
   0x6   :  { %p303_p3 = por %p302_p2, %p301_p1 }
   0x8   :  { %p304_p4 = pnand %p303_p3, %p297_p0 }
   0xa   :  { %307 = shalt.err (!%p304_p4)
}
   0xb   :  { %s333_s12 = smov 128   ;;  %s334_s13 = smov 8  }
   0xc   :  { %33 = dma.hbm_to_vmem [thread:$0]  %s434_s2, 1152, %s28_s10, [#allocation4], %s333_s12, %s333_s12, %s334_s13  }
   0xd   :  { %328 = dma.done.wait [#allocation4], 1152  }
   0xe   :  { %329 = vsyncadd [#allocation4], 4294966144  ;;  %v335_v0 = vmov 0.0   ;;  %vm336_vm0 = vmmov 0   ;;  %v52_v1 = vld [vmem:[#allocation3 + $0x40] sm:$0xff]  ;;  %v51_v2 = vld [vmem:[#allocation3 + $0x38] sm:$0xff]  ;;  %v127_v16 = vlaneseq }
   0xf   :  { %246 = vmatprep.subr.mxu0 %v335_v0  ;;  %264 = vmatprep.mubr.msk.f32.mxu0 %vm336_vm0, %v335_v0  ;;  %v50_v3 = vld [vmem:[#allocation3 + $0x30] sm:$0xff]  ;;  %v49_v4 = vld [vmem:[#allocation3 + $0x28] sm:$0xff]  ;;  %v48_v5 = vld [vmem:[#allocation3 + $0x20] sm:$0xff]  ;;  %vm53_vm1 = vcmask 588800   ;;  %s338_s19 = smov 32   ;;  %s339_s22 = smov 96  }
  0x10   :  { %247 = vmatpush3.msra.mxu0 %v52_v1  ;;  %v47_v6 = vld [vmem:[#allocation3 + $0x18] sm:$0xff]  ;;  %v46_v7 = vld [vmem:[#allocation3 + $0x10] sm:$0xff]  ;;  %v45_v8 = vld [vmem:[#allocation3 + $0x8] sm:$0xff]  ;;  %v128_v17 = vand.u32 127, %v127_v16  ;;  %vm174_vm5 = vcmask 261120   ;;  %s340_s23 = smov [#allocation6]  }
  0x11   :  { %248 = vmatprep.subr.mxu0 %v335_v0  ;;  %v44_v9 = vld [vmem:[#allocation3] sm:$0xff]  ;;  %s214_s24 = sshll.u32 %s340_s23, 4  ;;  %s215_s24 = int_to_ptr.vmem [resolvable:$true] %s214_s24 }
  0x12   :  { %249 = vmatpush3.msra.mxu0 %v51_v2  ;;  %v43_v10 = vld [vmem:[%s432_s0] sm:$0xff]  ;;  %vm129_vm2 = vcmp.ge.s32.totalorder %v128_v17, 64  ;;  %vm130_vm3 = vcmp.lt.s32.totalorder %v128_v17, 96  ;;  %s337_s0 = smov 64   ;;  %s308_s25 = scalar_lea.vmem %s215_s24, 128 }
  0x13   :  { %250 = vmatprep.subr.mxu0 %v335_v0  ;;  %vm131_vm4 = vmand %vm129_vm2, %vm130_vm3  ;;  %v143_v21 = vld [vmem:[%s433_s1] sm:$0xff]  ;;  %p309_p5 = scmp.ne.s32.totalorder %s215_s24, %s308_s25  ;;  %p313_p6 = scmp.lt.s32.totalorder %s215_s24, %s215_s24 }
  0x14   :  { %251 = vmatpush3.msra.mxu0 %v50_v3  ;;  %v233_v24 = vld [vmem:[%s435_s3] ss:$0 sm:$0xff]  ;;  %p314_p7 = scmp.lt.s32.totalorder %s308_s25, %s308_s25 }
  0x15   :  { %252 = vmatprep.subr.mxu0 %v335_v0 }
  0x16   :  { %253 = vmatpush3.msra.mxu0 %v49_v4  ;;  %p315_p8 = por %p314_p7, %p313_p6 }
  0x17   :  { %254 = vmatprep.subr.mxu0 %v335_v0 }
  0x18   :  { %255 = vmatpush3.msra.mxu0 %v48_v5  ;;  %p316_p9 = pnand %p315_p8, %p309_p5 }
  0x19   :  { %256 = vmatprep.subr.mxu0 %v335_v0 }
  0x1a   :  { %257 = vmatpush3.msra.mxu0 %v47_v6 }
  0x1b   :  { %258 = vmatprep.subr.mxu0 %v335_v0 }
  0x1c   :  { %259 = vmatpush3.msra.mxu0 %v46_v7 }
  0x1d   :  { %260 = vmatprep.subr.mxu0 %v335_v0 }
  0x1e   :  { %261 = vmatpush3.msra.mxu0 %v45_v8 }
  0x1f   :  { %262 = vmatprep.subr.mxu0 %v335_v0 }
  0x20   :  { %263 = vmatpush3.msra.mxu0 %v44_v9 }
  0x21   :  { %265 = vmatmul.mubr.msk.f32.vlgmr.msra.gmra.mxu0 %vm53_vm1, %v43_v10 }
  0xe1   :  { %v123_v11 = vpop.f32.mrf.mxu0 }
  0xe2   :  { %v232_v12 = vmul.f32 -1.442695, %v123_v11 }
  0xe3   :  { %v266_v13 = vpop.f32.mrf.mxu0 }
  0xe4   :  { %276 = vpow2.f32 %v232_v12 }
  0xe5   :  { %278 = vtanh.f32 %v123_v11 }
  0xf1   :  { %v277_v14 = vpop.eup %276 }
  0xf2   :  { %v136_v15 = vadd.f32 1.0, %v277_v14  ;;  %v279_v18 = vpop.eup %278 }
  0xf4   :  { %280 = vrcp.f32 %v136_v15 }
 0x101   :  { %v281_v19 = vpop.eup %280 }
 0x102   :  { %v139_v20 = vsel %vm131_vm4, %v279_v18, %v281_v19 }
 0x103   :  { %140 = vrot.lane.b32.xlu0 %v139_v20, %s337_s0 }
 0x107   :  { %145 = vrot.lane.b32.xlu0 %v143_v21, %s338_s19 }
 0x10b   :  { %166 = vrot.lane.b32.xlu0 %v233_v24, %s339_s22 }
 0x175   :  { %v141_v22 = vpop.permute.xlu0 %140 }
 0x176   :  { %v142_v23 = vmul.f32 %v141_v22, %v139_v20 }
 0x178   :  { %150 = vrot.lane.b32.xlu1 %v142_v23, %s338_s19 }
 0x179   :  { %v146_v25 = vpop.permute.xlu0 %145 }
 0x17a   :  { %v148_v26 = vmul.f32 %v146_v25, %v139_v20 }
 0x17d   :  { %v167_v31 = vpop.permute.xlu0 %166 }
 0x1ea   :  { %v151_v27 = vpop.permute.xlu1 %150 }
 0x1eb   :  { %v153_v28 = vadd.f32 %v151_v27, %v148_v26 }
 0x1ed   :  { %282 = vtanh.f32 %v153_v28 }
 0x1fa   :  { %v283_v29 = vpop.eup %282 }
 0x1fb   :  { %156 = vrot.lane.b32.xlu1 %v283_v29, %s337_s0 }
 0x26d   :  { %v157_v30 = vpop.permute.xlu1 %156 }
 0x26e   :  { %v159_v32 = vmul.f32 %v157_v30, %v139_v20 }
 0x270   :  { %v169_v33 = vmul.f32 %v167_v31, %v159_v32 }
 0x272   :  { %171 = vrot.lane.b32.xlu1 %v169_v33, %s338_s19 }
 0x276   :  { %195 = vrot.lane.b32.xlu1 %v159_v32, %s338_s19 }
 0x27a   :  { %200 = vrot.lane.b32.xlu1 %v153_v28, %s339_s22 }
 0x2e4   :  { %v172_v34 = vpop.permute.xlu1 %171 }
 0x2e5   :  { %v175_v35 = vsel %vm174_vm5, %v172_v34, 0.0 }
 0x2e6   :  { %176 = vadd.xlane.f32.xlu0 %v175_v35 }
 0x2e8   :  { %v196_v36 = vpop.permute.xlu1 %195 }
 0x2e9   :  { %198 = vst.msk [vmem:[#allocation6] sm:$0xff] %vm174_vm5, %v196_v36 }
 0x2ec   :  { %v201_v37 = vpop.permute.xlu1 %200 }
 0x2ed   :  { %203 = vst.msk [vmem:[%s441_s9] sm:$0xff] %vm174_vm5, %v201_v37 }
 0x2ee   :  { %319 = shalt.err (!%p316_p9)
}
 0x2ef   :  { %217 = dma.vmem_to_hbm [thread:$0]  %s215_s24, 128, %s440_s8, [#allocation5]   ;;  %v179_v38 = vstv %s437_s5  ;;  %v187_v44 = vld [vmem:[%s436_s4] sm:$0xff]  ;;  %vm191_vm6 = vcmask 7168  }
 0x36f   :  { %v177_v39 = vpop.xlane.xlu0 %176 }
 0x370   :  { %v180_v40 = vadd.f32 %v179_v38, %v177_v39 }
 0x372   :  { %v234_v41 = vmul.f32 -1.442695, %v180_v40 }
 0x374   :  { %284 = vpow2.f32 %v234_v41 }
 0x381   :  { %v285_v42 = vpop.eup %284 }
 0x382   :  { %v184_v43 = vadd.f32 1.0, %v285_v42 }
 0x384   :  { %286 = vrcp.f32 %v184_v43 }
 0x391   :  { %v287_v45 = vpop.eup %286 }
 0x392   :  { %vm188_vm7 = vcmp.gt.f32.partialorder %v287_v45, %v187_v44  ;;  %193 = vst.msk [vmem:[%s439_s7] sm:$0xff] %vm191_vm6, %v287_v45 }
 0x393   :  { %v235_v46 = vsel %vm188_vm7, 1.0, %v335_v0 }
 0x394   :  { %192 = vst.msk [vmem:[%s438_s6] sm:$0xff] %vm191_vm6, %v235_v46 }
 0x395   :  { %330 = dma.done.wait [#allocation5], 128  }
 0x396   :  { %331 = vsyncadd [#allocation5], 4294967168 }
 0x397   :  { %229 = vsyncpa [#allocation4], 1 }
 0x398   :  { %230 = vsyncpa [#allocation5], 1 }

</bundles_post_ra>
